<compile_context>
chip_gen: v7x
topology: tpu7x:2x2x1
jax: 0.10.0
libtpu: 0.0.40
codegen_flags: <defaults>
</compile_context>

<pallas_src>
import functools

import jax
import jax.numpy as jnp
from jax.experimental import pallas as pl
from jax.experimental.pallas import tpu as pltpu


def _round_up(n, m):
    return ((n + m - 1) // m) * m


def _vmem_capacity_bytes():
    # Conservative fallback = v7x (64 MiB); v5e/v6e report 128 MiB.
    try:
        return int(getattr(pltpu.get_tpu_info(), "vmem_capacity_bytes", 64 << 20))
    except Exception:
        return 64 << 20


def _encoder_kernel(x_ref, w1_ref, b1_ref, w2_ref, b2_ref, o_ref):
    # x_ref:  (TB, D_in)   original dtype (cast in-kernel -> no XLA cast pass)
    # w1_ref: (D_in, H_p)  compute dtype   b1_ref: (1, H_p)    f32
    # w2_ref: (H_p, D_out) compute dtype   b2_ref: (1, D_out)  f32
    # o_ref:  (TB, D_out)
    cdt = w1_ref.dtype
    x = x_ref[...].astype(cdt)
    h = jnp.dot(x, w1_ref[...], preferred_element_type=jnp.float32)
    # fused f32 bias + ReLU + downcast for the second MXU matmul
    h = jnp.maximum(h + b1_ref[...], 0.0).astype(cdt)
    y = jnp.dot(h, w2_ref[...], preferred_element_type=jnp.float32)
    y = jnp.maximum(y + b2_ref[...], 0.0)
    o_ref[...] = y.astype(o_ref.dtype)


def prepare_encoder_params(w1, b1, w2, b2, compute_dtype=jnp.bfloat16):
    """One-time pad/cast of weights & biases (do this at init, reuse per call).

    Only the hidden dim is padded to a lane-dense multiple of 128; the
    contraction dim D_in and the output dim D_out stay unpadded so that
    x / out need no wrapper-side copies.  Zero-padding is exact: padded
    hidden columns are relu(0 + 0) = 0 and multiply zero rows of w2.
    """
    D_in, H = w1.shape
    D_out = w2.shape[1]
    H_p = _round_up(H, 128)
    cdt = compute_dtype
    w1_p = jnp.zeros((D_in, H_p), cdt).at[:, :H].set(w1.astype(cdt))
    b1_p = jnp.zeros((1, H_p), jnp.float32).at[:, :H].set(
        b1.reshape(1, -1).astype(jnp.float32))
    w2_p = jnp.zeros((H_p, D_out), cdt).at[:H, :].set(w2.astype(cdt))
    b2_p = b2.reshape(1, -1).astype(jnp.float32)
    return w1_p, b1_p, w2_p, b2_p


@functools.partial(jax.jit, static_argnames=("block_b", "out_dtype"))
def encoder_forward(x, w1_p, b1_p, w2_p, b2_p, *, block_b=512, out_dtype=None):
    """Fused two-layer MLP encoder; params must come from prepare_encoder_params."""
    B, D_in = x.shape
    H_p, D_out = w2_p.shape
    if out_dtype is None:
        out_dtype = x.dtype          # pass jnp.bfloat16 to halve output traffic

    # Batch tile: multiple of 8 sublanes; aim for >= 2 grid steps so both
    # TensorCores get work on v7x (megacore sharding of the "parallel" axis).
    tb = max(8, min(_round_up(block_b, 8), _round_up(pl.cdiv(B, 2), 8)))

    cdt_sz = jnp.dtype(w1_p.dtype).itemsize
    x_sz = jnp.dtype(x.dtype).itemsize
    out_sz = jnp.dtype(out_dtype).itemsize
    weight_bytes = (D_in * H_p + H_p * D_out) * cdt_sz + (H_p + D_out) * 4

    vmem_cap = int(_vmem_capacity_bytes() * 0.75)   # headroom for Mosaic scratch

    def needed(t):
        return (weight_bytes                        # single-buffered (Buffered(1))
                + 2 * t * D_in * x_sz               # double-buffered x tiles
                + 2 * t * D_out * out_sz            # double-buffered out tiles
                + t * H_p * (4 + cdt_sz)            # f32 h + compute-dtype h
                + t * D_out * 4)                    # f32 y

    # Shrink the batch tile if it would overflow the generation's VMEM budget.
    while needed(tb) > vmem_cap and tb > 8:
        tb = max(8, _round_up(tb // 2, 8))
    # TODO(synk): if weight_bytes alone exceed vmem_cap, add a K-grid
    # accumulator path instead of keeping weights resident.

    vmem_limit = int(min(vmem_cap, max(needed(tb) + (4 << 20), 16 << 20)))
    cost = pl.CostEstimate(
        flops=2 * B * (D_in * H_p + H_p * D_out),
        transcendentals=0,
        bytes_accessed=int(B * D_in * x_sz + weight_bytes + B * D_out * out_sz),
    )

    grid = (pl.cdiv(B, tb),)
    resident = dict(pipeline_mode=pl.Buffered(1))   # constant index_map -> 1 buffer

    return pl.pallas_call(
        _encoder_kernel,
        out_shape=jax.ShapeDtypeStruct((B, D_out), out_dtype),
        grid_spec=pltpu.PrefetchScalarGridSpec(
            num_scalar_prefetch=0,
            grid=grid,
            in_specs=[
                pl.BlockSpec((tb, D_in), lambda i: (i, 0)),                  # x tile
                pl.BlockSpec((D_in, H_p), lambda i: (0, 0), **resident),     # W1
                pl.BlockSpec((1, H_p), lambda i: (0, 0), **resident),        # b1
                pl.BlockSpec((H_p, D_out), lambda i: (0, 0), **resident),    # W2
                pl.BlockSpec((1, D_out), lambda i: (0, 0), **resident),      # b2
            ],
            out_specs=pl.BlockSpec((tb, D_out), lambda i: (i, 0)),
        ),
        compiler_params=pltpu.CompilerParams(
            dimension_semantics=("parallel",),
            vmem_limit_bytes=vmem_limit),
        cost_estimate=cost,
    )(x, w1_p, b1_p, w2_p, b2_p)


def init_encoder_params(key, D_in, H, D_out, dtype=jnp.float32):
    """Deterministic init mimicking nn.Linear's U(-1/sqrt(fan_in), 1/sqrt(fan_in))."""
    k1, k2, k3, k4 = jax.random.split(key, 4)
    lim1 = 1.0 / jnp.sqrt(jnp.array(D_in, dtype))
    lim2 = 1.0 / jnp.sqrt(jnp.array(H, dtype))
    # stored pre-transposed: (in, out)
    w1 = jax.random.uniform(k1, (D_in, H), dtype, -lim1, lim1)
    b1 = jax.random.uniform(k2, (1, H), dtype, -lim1, lim1)
    w2 = jax.random.uniform(k3, (H, D_out), dtype, -lim2, lim2)
    b2 = jax.random.uniform(k4, (1, D_out), dtype, -lim2, lim2)
    return w1, b1, w2, b2


def encoder_ref(x, w1, b1, w2, b2, compute_dtype=jnp.bfloat16):
    """Pure-JAX reference mirroring the kernel's bf16-matmul / f32-accumulate path."""
    cdt = compute_dtype
    h = jnp.dot(x.astype(cdt), w1.astype(cdt), preferred_element_type=jnp.float32)
    h = jnp.maximum(h + b1.reshape(1, -1).astype(jnp.float32), 0.0)
    y = jnp.dot(h.astype(cdt), w2.astype(cdt), preferred_element_type=jnp.float32)
    return jnp.maximum(y + b2.reshape(1, -1).astype(jnp.float32), 0.0)


if __name__ == "__main__":
    # Small shapes consistent with the module: x is (batch, D_in)
    B, D_in, H, D_out = 8, 32, 64, 16

    key = jax.random.PRNGKey(0)
    kx, kp = jax.random.split(key)
    x = jax.random.normal(kx, (B, D_in), jnp.float32)
    w1, b1, w2, b2 = init_encoder_params(kp, D_in, H, D_out)

    # Pad/cast weights once (at "module init" time), reuse for every forward.
    params = prepare_encoder_params(w1, b1, w2, b2)

    out = encoder_forward(x, *params)
    out = jax.block_until_ready(out)

    ref = encoder_ref(x, w1, b1, w2, b2)
    assert out.shape == (B, D_out)
    assert jnp.allclose(out.astype(jnp.float32), ref, atol=1e-2, rtol=1e-2), \
        "mismatch vs reference"

    print("KERNEL_OK")
</pallas_src>

<mosaic_0001>
module attributes {stable_mosaic.version = 11 : i64} {
  func.func @_encoder_kernel(%arg0: i32, %arg1: memref<8x32xf32, #tpu.memory_space<vmem>>, %arg2: memref<32x128xbf16, #tpu.memory_space<vmem>>, %arg3: memref<1x128xf32, #tpu.memory_space<vmem>>, %arg4: memref<128x16xbf16, #tpu.memory_space<vmem>>, %arg5: memref<1x16xf32, #tpu.memory_space<vmem>>, %arg6: memref<8x16xf32, #tpu.memory_space<vmem>>) attributes {dimension_semantics = [#tpu.dimension_semantics<parallel>], iteration_bounds = array<i64: 1>, scalar_prefetch = 0 : i64, scratch_operands = 0 : i64, tpu.core_type = #tpu.core_type<tc>, window_params = [{transform_indices = @transform_0, window_bounds = array<i64: 8, 32>}, {pipeline_mode = #tpu.pipeline_mode<synchronous>, transform_indices = @transform_1, window_bounds = array<i64: 32, 128>}, {pipeline_mode = #tpu.pipeline_mode<synchronous>, transform_indices = @transform_2, window_bounds = array<i64: 1, 128>}, {pipeline_mode = #tpu.pipeline_mode<synchronous>, transform_indices = @transform_3, window_bounds = array<i64: 128, 16>}, {pipeline_mode = #tpu.pipeline_mode<synchronous>, transform_indices = @transform_4, window_bounds = array<i64: 1, 16>}, {transform_indices = @transform_5, window_bounds = array<i64: 8, 16>}]} {
    %c0 = arith.constant 0 : index
    %c0_0 = arith.constant 0 : index
    %0 = vector.load %arg1[%c0, %c0_0] : memref<8x32xf32, #tpu.memory_space<vmem>>, vector<8x32xf32>
    %1 = arith.truncf %0 : vector<8x32xf32> to vector<8x32xbf16>
    %c0_1 = arith.constant 0 : index
    %c0_2 = arith.constant 0 : index
    %2 = vector.load %arg2[%c0_1, %c0_2] : memref<32x128xbf16, #tpu.memory_space<vmem>>, vector<32x128xbf16>
    %cst = arith.constant dense<0.000000e+00> : vector<8x128xf32>
    %3 = tpu.matmul %1, %2, %cst {dimension_numbers = #tpu.dot_dimension_numbers<[1], [0], [0], [1], [0, 0, 1, 1], [], []>} : vector<8x32xbf16>, vector<32x128xbf16>, vector<8x128xf32> -> vector<8x128xf32>
    %c0_3 = arith.constant 0 : index
    %c0_4 = arith.constant 0 : index
    %4 = vector.load %arg3[%c0_3, %c0_4] : memref<1x128xf32, #tpu.memory_space<vmem>>, vector<1x128xf32>
    %5 = vector.broadcast %4 : vector<1x128xf32> to vector<8x128xf32>
    %6 = arith.addf %3, %5 : vector<8x128xf32>
    %cst_5 = arith.constant 0.000000e+00 : f32
    %7 = vector.broadcast %cst_5 : f32 to vector<8x128xf32>
    %8 = arith.maximumf %6, %7 : vector<8x128xf32>
    %9 = arith.truncf %8 : vector<8x128xf32> to vector<8x128xbf16>
    %c0_6 = arith.constant 0 : index
    %c0_7 = arith.constant 0 : index
    %10 = vector.load %arg4[%c0_6, %c0_7] : memref<128x16xbf16, #tpu.memory_space<vmem>>, vector<128x16xbf16>
    %cst_8 = arith.constant dense<0.000000e+00> : vector<8x16xf32>
    %11 = tpu.matmul %9, %10, %cst_8 {dimension_numbers = #tpu.dot_dimension_numbers<[1], [0], [0], [1], [0, 0, 1, 1], [], []>} : vector<8x128xbf16>, vector<128x16xbf16>, vector<8x16xf32> -> vector<8x16xf32>
    %c0_9 = arith.constant 0 : index
    %c0_10 = arith.constant 0 : index
    %12 = vector.load %arg5[%c0_9, %c0_10] : memref<1x16xf32, #tpu.memory_space<vmem>>, vector<1x16xf32>
    %13 = vector.broadcast %12 : vector<1x16xf32> to vector<8x16xf32>
    %14 = arith.addf %11, %13 : vector<8x16xf32>
    %cst_11 = arith.constant 0.000000e+00 : f32
    %15 = vector.broadcast %cst_11 : f32 to vector<8x16xf32>
    %16 = arith.maximumf %14, %15 : vector<8x16xf32>
    %c0_12 = arith.constant 0 : index
    %c0_13 = arith.constant 0 : index
    %17 = vector.load %arg6[%c0_12, %c0_13] : memref<8x16xf32, #tpu.memory_space<vmem>>, vector<8x16xf32>
    tpu.vector_store %arg6[%c0_12, %c0_13], %16 {strides = array<i32>} : memref<8x16xf32, #tpu.memory_space<vmem>>, vector<8x16xf32>,
    return
  }
  func.func @transform_0(%arg0: i32) -> (i32, i32) {
    %c0_i32 = arith.constant 0 : i32
    %c0_i32_0 = arith.constant 0 : i32
    return %arg0, %c0_i32 : i32, i32
  }
  func.func @transform_1(%arg0: i32) -> (i32, i32) {
    %c0_i32 = arith.constant 0 : i32
    %c0_i32_0 = arith.constant 0 : i32
    %c0_i32_1 = arith.constant 0 : i32
    return %c0_i32, %c0_i32_0 : i32, i32
  }
  func.func @transform_2(%arg0: i32) -> (i32, i32) {
    %c0_i32 = arith.constant 0 : i32
    %c0_i32_0 = arith.constant 0 : i32
    %c0_i32_1 = arith.constant 0 : i32
    return %c0_i32, %c0_i32_0 : i32, i32
  }
  func.func @transform_3(%arg0: i32) -> (i32, i32) {
    %c0_i32 = arith.constant 0 : i32
    %c0_i32_0 = arith.constant 0 : i32
    %c0_i32_1 = arith.constant 0 : i32
    return %c0_i32, %c0_i32_0 : i32, i32
  }
  func.func @transform_4(%arg0: i32) -> (i32, i32) {
    %c0_i32 = arith.constant 0 : i32
    %c0_i32_0 = arith.constant 0 : i32
    %c0_i32_1 = arith.constant 0 : i32
    return %c0_i32, %c0_i32_0 : i32, i32
  }
  func.func @transform_5(%arg0: i32) -> (i32, i32) {
    %c0_i32 = arith.constant 0 : i32
    %c0_i32_0 = arith.constant 0 : i32
    return %arg0, %c0_i32 : i32, i32
  }
}

</mosaic_0001>

<bundles_post_ra>
// kernel: encoder_forward.1
= control target key start
LH: loop header
LB: loop body
LE: loop exit
PB: predicated region body
PF: predicated region fallthrough
CT: control target
= control target key end

     0   :  { %v311_v1 = vmov 0.0   ;;  %vm312_vm0 = vmmov 0   ;;  %vm47_vm1 = vcmask 261120   ;;  %s395_s0 = inlined_call_operand.vmem [shape: f32[8,32], index: 0, kind: input, shape index: {}]   ;;  %s396_s1 = inlined_call_operand.vmem [shape: bf16[32,128], index: 1, kind: input, shape index: {}]   ;;  %s397_s2 = inlined_call_operand.vmem [shape: f32[1,128], index: 2, kind: input, shape index: {}]   ;;  %s398_s3 = inlined_call_operand.vmem [shape: bf16[128,16], index: 3, kind: input, shape index: {}]   ;;  %s399_s4 = inlined_call_operand.vmem [shape: f32[1,16], index: 4, kind: input, shape index: {}]   ;;  %s400_s5 = inlined_call_operand.hbm [shape: f32[8,16], index: 5, kind: output, shape index: {}]  }
   0x1   :  { %v277_v0 = vld [vmem:[%s396_s1] sm:$0xff]   ;;  %246 = vmatprep.subr.bf16.mxu0 %v311_v1  ;;  %v278_v2 = vld [vmem:[%s396_s1 + $0x8] sm:$0xff]   ;;  %254 = vmatprep.subr.bf16.mxu1 %v311_v1  ;;  %v281_v7 = vld [vmem:[%s398_s3 + $0x10] sm:$0xff]  }
   0x2   :  { %247 = vmatpush3.bf16.msra.mxu0 %v277_v0  ;;  %250 = vmatprep.mubr.msk.bf16.mxu0 %vm312_vm0, %v311_v1  ;;  %v22_v3 = vld [vmem:[%s395_s0] sm:$0xff]  ;;  %v280_v6 = vld [vmem:[%s398_s3 + $0x8] sm:$0xff]  }
   0x3   :  { %248 = vmatprep.subr.bf16.mxu0 %v311_v1  ;;  %v279_v4 = vld [vmem:[%s398_s3] sm:$0xff]   ;;  %270 = vmatprep.mubr.msk.bf16.mxu1 %vm312_vm0, %v311_v1  ;;  %v23_v5 = vpack.c.bf16 %v22_v3, %v22_v3 }
   0x4   :  { %255 = vmatpush3.bf16.msra.mxu1 %v279_v4 }
   0x5   :  { %256 = vmatprep.subr.bf16.mxu1 %v311_v1 }
   0x6   :  { %249 = vmatpush3.bf16.msra.mxu0 %v278_v2 }
   0x8   :  { %257 = vmatpush3.bf16.msra.mxu1 %v280_v6 }
   0x9   :  { %251 = vmatmul.mubr.msk.bf16.vlgmr.msra.gmra.mrb[0].mxu0 %vm47_vm1, %v23_v5  ;;  %258 = vmatprep.subr.bf16.mxu1 %v311_v1 }
   0xa   :  { %10 = vsyncpa [#allocation3], 0  ;;  %v282_v8 = vld [vmem:[%s398_s3 + $0x18] sm:$0xff]   ;;  %v283_v9 = vld [vmem:[%s398_s3 + $0x20] sm:$0xff]   ;;  %s313_s17 = smov [#allocation2]   ;;  %vm205_vm2 = vcmask 130048  }
   0xb   :  { %v284_v10 = vld [vmem:[%s398_s3 + $0x28] sm:$0xff]   ;;  %v285_v11 = vld [vmem:[%s398_s3 + $0x30] sm:$0xff]   ;;  %v286_v12 = vld [vmem:[%s398_s3 + $0x38] sm:$0xff]   ;;  %s213_s3 = sshll.u32 %s313_s17, 4  ;;  %s214_s3 = int_to_ptr.vmem [resolvable:$true] %s213_s3 }
   0xc   :  { %259 = vmatpush3.bf16.msra.mxu1 %v281_v7  ;;  %v221_v13 = vld [vmem:[%s397_s2] ss:$0 sm:$0xff]  ;;  %s287_s2 = scalar_lea.vmem %s214_s3, 128  ;;  %p292_p1 = scmp.lt.s32.totalorder %s214_s3, %s214_s3 }
   0xd   :  { %260 = vmatprep.subr.bf16.mxu1 %v311_v1  ;;  %v225_v21 = vld [vmem:[%s399_s4] ss:$0 sm:$0xff]  ;;  %p288_p0 = scmp.ne.s32.totalorder %s214_s3, %s287_s2  ;;  %p293_p2 = scmp.lt.s32.totalorder %s287_s2, %s287_s2 }
   0xf   :  { %p294_p3 = por %p293_p2, %p292_p1 }
  0x10   :  { %261 = vmatpush3.bf16.msra.mxu1 %v282_v8 }
  0x11   :  { %262 = vmatprep.subr.bf16.mxu1 %v311_v1  ;;  %p295_p4 = pnand %p294_p3, %p288_p0 }
  0x14   :  { %263 = vmatpush3.bf16.msra.mxu1 %v283_v9 }
  0x15   :  { %264 = vmatprep.subr.bf16.mxu1 %v311_v1 }
  0x18   :  { %265 = vmatpush3.bf16.msra.mxu1 %v284_v10 }
  0x19   :  { %266 = vmatprep.subr.bf16.mxu1 %v311_v1 }
  0x1c   :  { %267 = vmatpush3.bf16.msra.mxu1 %v285_v11 }
  0x1d   :  { %268 = vmatprep.subr.bf16.mxu1 %v311_v1 }
  0x20   :  { %269 = vmatpush3.bf16.msra.mxu1 %v286_v12 }
  0xdc   :  { %v85_v14 = vpop.f32.mrb[0].mxu0 }
  0xdd   :  { %v86_v15 = vadd.f32 %v221_v13, %v85_v14  ;;  %v252_v16 = vpop.f32.mrb[1].mxu0 }
  0xde   :  { %v88_v17 = vpop.f32.mrb[2].mxu0 }
  0xdf   :  { %v91_v18 = vmax.f32 %v86_v15, 0.0  ;;  %v253_v19 = vpop.f32.mrb[3].mxu0 }
  0xe1   :  { %v92_v20 = vpack.c.bf16 %v91_v18, %v91_v18 }
  0xe3   :  { %271 = vmatmul.mubr.bf16.vlgmr.msra.gmra.mrb[0].mxu1 %v92_v20 }
 0x1b6   :  { %v198_v22 = vpop.f32.mrb[0].mxu1 }
 0x1b7   :  { %v199_v23 = vadd.f32 %v225_v21, %v198_v22  ;;  %v272_v24 = vpop.f32.mrb[1].mxu1 }
 0x1b8   :  { %v201_v25 = vpop.f32.mrb[2].mxu1 }
 0x1b9   :  { %v204_v26 = vmax.f32 %v199_v23, 0.0  ;;  %v273_v27 = vpop.f32.mrb[3].mxu1 }
 0x1bb   :  { %206 = vst.msk [vmem:[#allocation2] sm:$0xff] %vm205_vm2, %v204_v26 }
 0x1bc   :  { %298 = shalt.err (!%p295_p4)
}
 0x1bd   :  { %s299_s19 = scalar_lea.hbm %s400_s5, 128 }
 0x1be   :  { %p300_p5 = scmp.ne.s32.totalorder %s400_s5, %s299_s19  ;;  %p303_p6 = scmp.lt.u32.totalorder %s299_s19, %s400_s5 }
 0x1c0   :  { %p305_p7 = pnand %p303_p6, %p300_p5 }
 0x1c2   :  { %308 = shalt.err (!%p305_p7)
}
 0x1c3   :  { %216 = dma.vmem_to_hbm [thread:$0]  %s214_s3, 128, %s400_s5, [#allocation3]  }
 0x1c4   :  { %309 = dma.done.wait [#allocation3], 128  }
 0x1c5   :  { %310 = vsyncadd [#allocation3], 4294967168 }
 0x1c6   :  { %220 = vsyncpa [#allocation3], 1 }

</bundles_post_ra>
